<compile_context>
chip_gen: v7x
topology: tpu7x:2x2x1
jax: 0.10.0
libtpu: 0.0.40
codegen_flags: <defaults>
</compile_context>

<pallas_src>
import functools

import jax
import jax.numpy as jnp
from jax.experimental import pallas as pl
from jax.experimental.pallas import tpu as pltpu

NUM_LAYERS = 5
DP = 128  # padded (lane-dense) feature width


# ---------------------------------------------------------------------------
# Fused Pallas kernel: 5 x (SAGEConv + ReLU)
# ---------------------------------------------------------------------------
def _fused_gsage_kernel(a_ref, x_ref, w_ref, b_ref, o_ref):
    """a_ref: [N, N] bf16 row-normalized adjacency
       x_ref: [N, DP] bf16 zero-padded node features
       w_ref: [5, 2*DP, DP] bf16 stacked [Wl ; Wr] per layer (zero-padded)
       b_ref: [5, 1, DP] f32 biases (zero-padded)
       o_ref: [N, DP] f32 final-layer output (cols >= output_dim are 0)
    """
    a = a_ref[...]                        # bf16, resident for all layers
    h = x_ref[...].astype(jnp.float32)    # f32 activation carried in vregs
    for l in range(NUM_LAYERS):           # static unroll, traced once
        h_bf = h.astype(jnp.bfloat16)
        # mean-neighbor aggregation on the MXU
        agg = jnp.dot(a, h_bf, preferred_element_type=jnp.float32)
        # single K=2*DP matmul: [agg | h] @ [Wl ; Wr]
        cat = jnp.concatenate([agg.astype(jnp.bfloat16), h_bf], axis=1)
        out = jnp.dot(cat, w_ref[l], preferred_element_type=jnp.float32) + b_ref[l]
        h = jnp.maximum(out, 0.0)         # ReLU after every conv (matches module)
    o_ref[...] = h


def graphsage_forward(adj_bf16, x_pad_bf16, w_stacked, b_stacked,
                      batch_size, output_dim):
    n = x_pad_bf16.shape[0]
    vmem = pl.BlockSpec(memory_space=pltpu.MemorySpace.VMEM)
    out = pl.pallas_call(
        _fused_gsage_kernel,
        out_shape=jax.ShapeDtypeStruct((n, DP), jnp.float32),
        in_specs=[vmem, vmem, vmem, vmem],
        out_specs=vmem,
    )(adj_bf16, x_pad_bf16, w_stacked, b_stacked)
    # x.view(batch_size, 17)
    return out[:, :output_dim].reshape(batch_size, output_dim)


# ---------------------------------------------------------------------------
# Host-side parameter / graph construction (deterministic, synthetic)
# ---------------------------------------------------------------------------
def make_sage_params(key, d_in, d_out):
    k1, k2, k3 = jax.random.split(key, 3)
    scale = 1.0 / jnp.sqrt(jnp.float32(d_in))
    # stored as [d_in, d_out] so the kernel does x @ W (== x @ W_torch.T)
    w_l = jax.random.normal(k1, (d_in, d_out), jnp.float32) * scale
    w_r = jax.random.normal(k2, (d_in, d_out), jnp.float32) * scale
    b = jax.random.normal(k3, (d_out,), jnp.float32) * scale
    return w_l, w_r, b


def pack_params(params):
    """Zero-pad each layer's (Wl, Wr, b) to ([2*DP, DP], [1, DP]) and stack."""
    w_stack, b_stack = [], []
    for w_l, w_r, b in params:
        d_in, d_out = w_l.shape
        w = jnp.zeros((2 * DP, DP), jnp.float32)
        w = w.at[:d_in, :d_out].set(w_l)            # rows for the agg half
        w = w.at[DP:DP + d_in, :d_out].set(w_r)     # rows for the self half
        w_stack.append(w)
        b_stack.append(jnp.zeros((1, DP), jnp.float32).at[0, :d_out].set(b))
    return (jnp.stack(w_stack).astype(jnp.bfloat16),   # [5, 2*DP, DP] bf16
            jnp.stack(b_stack))                        # [5, 1, DP]    f32


def build_adjacency(edge_index, num_nodes):
    """Dense row-normalized adjacency: A[i, j] = 1/deg(i) for edge j -> i."""
    src, dst = edge_index[0], edge_index[1]
    adj = jnp.zeros((num_nodes, num_nodes), jnp.float32).at[dst, src].add(1.0)
    deg = adj.sum(axis=1, keepdims=True)
    return jnp.where(deg > 0, adj / jnp.maximum(deg, 1.0), 0.0)


# TODO(synk): dense N x N adjacency is O(N^2); switch to a CSR gather path
# (PrefetchScalarGridSpec + manual DMA) and row-tiled grid before N grows.

if __name__ == "__main__":
    # Self-consistent small shapes: num_nodes = batch_size = 8, output_dim = 17
    # so x.view(batch_size, 17) is valid.
    num_nodes = 8
    batch_size = 8
    input_dim = 16
    hidden_dim = 32
    output_dim = 17
    num_neighbors = 4

    key = jax.random.PRNGKey(0)
    kx, k1, k2, k3, k4, k5 = jax.random.split(key, 6)

    # node features
    x = jax.random.normal(kx, (num_nodes, input_dim), jnp.float32)

    # deterministic ring-style edge_index [2, E] (src row 0, dst row 1)
    dst = jnp.repeat(jnp.arange(num_nodes), num_neighbors)
    src = (
        jnp.arange(num_nodes)[:, None] + jnp.arange(1, num_neighbors + 1)[None, :]
    ).reshape(-1) % num_nodes
    edge_index = jnp.stack([src, dst], axis=0).astype(jnp.int32)

    # 5 SAGEConv layers: in->h, h->h, h->h, h->h, h->out
    params = [
        make_sage_params(k1, input_dim, hidden_dim),
        make_sage_params(k2, hidden_dim, hidden_dim),
        make_sage_params(k3, hidden_dim, hidden_dim),
        make_sage_params(k4, hidden_dim, hidden_dim),
        make_sage_params(k5, hidden_dim, output_dim),
    ]

    # Host-side preprocessing, hoisted out of the per-call path:
    adj = build_adjacency(edge_index, num_nodes).astype(jnp.bfloat16)  # deg=4 exact
    x_pad = (
        jnp.zeros((num_nodes, DP), jnp.float32).at[:, :input_dim].set(x)
    ).astype(jnp.bfloat16)
    w_stacked, b_stacked = pack_params(params)

    fwd = jax.jit(
        functools.partial(
            graphsage_forward, batch_size=batch_size, output_dim=output_dim
        )
    )
    out = fwd(adj, x_pad, w_stacked, b_stacked)
    jax.block_until_ready(out)

    assert out.shape == (batch_size, 17), out.shape
    print("KERNEL_OK")
</pallas_src>

<mosaic_0001>
module attributes {stable_mosaic.version = 11 : i64} {
  func.func @_fused_gsage_kernel(%arg0: memref<8x8xbf16, #tpu.memory_space<vmem>>, %arg1: memref<8x128xbf16, #tpu.memory_space<vmem>>, %arg2: memref<5x256x128xbf16, #tpu.memory_space<vmem>>, %arg3: memref<5x1x128xf32, #tpu.memory_space<vmem>>, %arg4: memref<8x128xf32, #tpu.memory_space<vmem>>) attributes {dimension_semantics = [], scalar_prefetch = 0 : i64, scratch_operands = 0 : i64, tpu.core_type = #tpu.core_type<tc>} {
    %c0 = arith.constant 0 : index
    %c0_0 = arith.constant 0 : index
    %0 = vector.load %arg0[%c0, %c0_0] : memref<8x8xbf16, #tpu.memory_space<vmem>>, vector<8x8xbf16>
    %c0_1 = arith.constant 0 : index
    %c0_2 = arith.constant 0 : index
    %1 = vector.load %arg1[%c0_1, %c0_2] : memref<8x128xbf16, #tpu.memory_space<vmem>>, vector<8x128xbf16>
    %2 = arith.extf %1 : vector<8x128xbf16> to vector<8x128xf32>
    %3 = arith.truncf %2 : vector<8x128xf32> to vector<8x128xbf16>
    %cst = arith.constant dense<0.000000e+00> : vector<8x128xf32>
    %4 = tpu.matmul %0, %3, %cst {dimension_numbers = #tpu.dot_dimension_numbers<[1], [0], [0], [1], [0, 0, 1, 1], [], []>} : vector<8x8xbf16>, vector<8x128xbf16>, vector<8x128xf32> -> vector<8x128xf32>
    %5 = arith.truncf %4 : vector<8x128xf32> to vector<8x128xbf16>
    %6 = tpu.concatenate %5, %3 in 1 : vector<8x128xbf16>, vector<8x128xbf16> -> vector<8x256xbf16>
    %c0_3 = arith.constant 0 : index
    %c0_4 = arith.constant 0 : index
    %c0_5 = arith.constant 0 : index
    %7 = vector.load %arg2[%c0_3, %c0_4, %c0_5] : memref<5x256x128xbf16, #tpu.memory_space<vmem>>, vector<1x256x128xbf16>
    %8 = vector.shape_cast %7 : vector<1x256x128xbf16> to vector<256x128xbf16>
    %cst_6 = arith.constant dense<0.000000e+00> : vector<8x128xf32>
    %9 = tpu.matmul %6, %8, %cst_6 {dimension_numbers = #tpu.dot_dimension_numbers<[1], [0], [0], [1], [0, 0, 1, 1], [], []>} : vector<8x256xbf16>, vector<256x128xbf16>, vector<8x128xf32> -> vector<8x128xf32>
    %c0_7 = arith.constant 0 : index
    %c0_8 = arith.constant 0 : index
    %c0_9 = arith.constant 0 : index
    %10 = vector.load %arg3[%c0_7, %c0_8, %c0_9] : memref<5x1x128xf32, #tpu.memory_space<vmem>>, vector<1x1x128xf32>
    %11 = vector.shape_cast %10 : vector<1x1x128xf32> to vector<1x128xf32>
    %12 = vector.broadcast %11 : vector<1x128xf32> to vector<8x128xf32>
    %13 = arith.addf %9, %12 : vector<8x128xf32>
    %cst_10 = arith.constant 0.000000e+00 : f32
    %14 = vector.broadcast %cst_10 : f32 to vector<8x128xf32>
    %15 = arith.maximumf %13, %14 : vector<8x128xf32>
    %16 = arith.truncf %15 : vector<8x128xf32> to vector<8x128xbf16>
    %cst_11 = arith.constant dense<0.000000e+00> : vector<8x128xf32>
    %17 = tpu.matmul %0, %16, %cst_11 {dimension_numbers = #tpu.dot_dimension_numbers<[1], [0], [0], [1], [0, 0, 1, 1], [], []>} : vector<8x8xbf16>, vector<8x128xbf16>, vector<8x128xf32> -> vector<8x128xf32>
    %18 = arith.truncf %17 : vector<8x128xf32> to vector<8x128xbf16>
    %19 = tpu.concatenate %18, %16 in 1 : vector<8x128xbf16>, vector<8x128xbf16> -> vector<8x256xbf16>
    %c1 = arith.constant 1 : index
    %c0_12 = arith.constant 0 : index
    %c0_13 = arith.constant 0 : index
    %20 = vector.load %arg2[%c1, %c0_12, %c0_13] : memref<5x256x128xbf16, #tpu.memory_space<vmem>>, vector<1x256x128xbf16>
    %21 = vector.shape_cast %20 : vector<1x256x128xbf16> to vector<256x128xbf16>
    %cst_14 = arith.constant dense<0.000000e+00> : vector<8x128xf32>
    %22 = tpu.matmul %19, %21, %cst_14 {dimension_numbers = #tpu.dot_dimension_numbers<[1], [0], [0], [1], [0, 0, 1, 1], [], []>} : vector<8x256xbf16>, vector<256x128xbf16>, vector<8x128xf32> -> vector<8x128xf32>
    %c1_15 = arith.constant 1 : index
    %c0_16 = arith.constant 0 : index
    %c0_17 = arith.constant 0 : index
    %23 = vector.load %arg3[%c1_15, %c0_16, %c0_17] : memref<5x1x128xf32, #tpu.memory_space<vmem>>, vector<1x1x128xf32>
    %24 = vector.shape_cast %23 : vector<1x1x128xf32> to vector<1x128xf32>
    %25 = vector.broadcast %24 : vector<1x128xf32> to vector<8x128xf32>
    %26 = arith.addf %22, %25 : vector<8x128xf32>
    %cst_18 = arith.constant 0.000000e+00 : f32
    %27 = vector.broadcast %cst_18 : f32 to vector<8x128xf32>
    %28 = arith.maximumf %26, %27 : vector<8x128xf32>
    %29 = arith.truncf %28 : vector<8x128xf32> to vector<8x128xbf16>
    %cst_19 = arith.constant dense<0.000000e+00> : vector<8x128xf32>
    %30 = tpu.matmul %0, %29, %cst_19 {dimension_numbers = #tpu.dot_dimension_numbers<[1], [0], [0], [1], [0, 0, 1, 1], [], []>} : vector<8x8xbf16>, vector<8x128xbf16>, vector<8x128xf32> -> vector<8x128xf32>
    %31 = arith.truncf %30 : vector<8x128xf32> to vector<8x128xbf16>
    %32 = tpu.concatenate %31, %29 in 1 : vector<8x128xbf16>, vector<8x128xbf16> -> vector<8x256xbf16>
    %c2 = arith.constant 2 : index
    %c0_20 = arith.constant 0 : index
    %c0_21 = arith.constant 0 : index
    %33 = vector.load %arg2[%c2, %c0_20, %c0_21] : memref<5x256x128xbf16, #tpu.memory_space<vmem>>, vector<1x256x128xbf16>
    %34 = vector.shape_cast %33 : vector<1x256x128xbf16> to vector<256x128xbf16>
    %cst_22 = arith.constant dense<0.000000e+00> : vector<8x128xf32>
    %35 = tpu.matmul %32, %34, %cst_22 {dimension_numbers = #tpu.dot_dimension_numbers<[1], [0], [0], [1], [0, 0, 1, 1], [], []>} : vector<8x256xbf16>, vector<256x128xbf16>, vector<8x128xf32> -> vector<8x128xf32>
    %c2_23 = arith.constant 2 : index
    %c0_24 = arith.constant 0 : index
    %c0_25 = arith.constant 0 : index
    %36 = vector.load %arg3[%c2_23, %c0_24, %c0_25] : memref<5x1x128xf32, #tpu.memory_space<vmem>>, vector<1x1x128xf32>
    %37 = vector.shape_cast %36 : vector<1x1x128xf32> to vector<1x128xf32>
    %38 = vector.broadcast %37 : vector<1x128xf32> to vector<8x128xf32>
    %39 = arith.addf %35, %38 : vector<8x128xf32>
    %cst_26 = arith.constant 0.000000e+00 : f32
    %40 = vector.broadcast %cst_26 : f32 to vector<8x128xf32>
    %41 = arith.maximumf %39, %40 : vector<8x128xf32>
    %42 = arith.truncf %41 : vector<8x128xf32> to vector<8x128xbf16>
    %cst_27 = arith.constant dense<0.000000e+00> : vector<8x128xf32>
    %43 = tpu.matmul %0, %42, %cst_27 {dimension_numbers = #tpu.dot_dimension_numbers<[1], [0], [0], [1], [0, 0, 1, 1], [], []>} : vector<8x8xbf16>, vector<8x128xbf16>, vector<8x128xf32> -> vector<8x128xf32>
    %44 = arith.truncf %43 : vector<8x128xf32> to vector<8x128xbf16>
    %45 = tpu.concatenate %44, %42 in 1 : vector<8x128xbf16>, vector<8x128xbf16> -> vector<8x256xbf16>
    %c3 = arith.constant 3 : index
    %c0_28 = arith.constant 0 : index
    %c0_29 = arith.constant 0 : index
    %46 = vector.load %arg2[%c3, %c0_28, %c0_29] : memref<5x256x128xbf16, #tpu.memory_space<vmem>>, vector<1x256x128xbf16>
    %47 = vector.shape_cast %46 : vector<1x256x128xbf16> to vector<256x128xbf16>
    %cst_30 = arith.constant dense<0.000000e+00> : vector<8x128xf32>
    %48 = tpu.matmul %45, %47, %cst_30 {dimension_numbers = #tpu.dot_dimension_numbers<[1], [0], [0], [1], [0, 0, 1, 1], [], []>} : vector<8x256xbf16>, vector<256x128xbf16>, vector<8x128xf32> -> vector<8x128xf32>
    %c3_31 = arith.constant 3 : index
    %c0_32 = arith.constant 0 : index
    %c0_33 = arith.constant 0 : index
    %49 = vector.load %arg3[%c3_31, %c0_32, %c0_33] : memref<5x1x128xf32, #tpu.memory_space<vmem>>, vector<1x1x128xf32>
    %50 = vector.shape_cast %49 : vector<1x1x128xf32> to vector<1x128xf32>
    %51 = vector.broadcast %50 : vector<1x128xf32> to vector<8x128xf32>
    %52 = arith.addf %48, %51 : vector<8x128xf32>
    %cst_34 = arith.constant 0.000000e+00 : f32
    %53 = vector.broadcast %cst_34 : f32 to vector<8x128xf32>
    %54 = arith.maximumf %52, %53 : vector<8x128xf32>
    %55 = arith.truncf %54 : vector<8x128xf32> to vector<8x128xbf16>
    %cst_35 = arith.constant dense<0.000000e+00> : vector<8x128xf32>
    %56 = tpu.matmul %0, %55, %cst_35 {dimension_numbers = #tpu.dot_dimension_numbers<[1], [0], [0], [1], [0, 0, 1, 1], [], []>} : vector<8x8xbf16>, vector<8x128xbf16>, vector<8x128xf32> -> vector<8x128xf32>
    %57 = arith.truncf %56 : vector<8x128xf32> to vector<8x128xbf16>
    %58 = tpu.concatenate %57, %55 in 1 : vector<8x128xbf16>, vector<8x128xbf16> -> vector<8x256xbf16>
    %c4 = arith.constant 4 : index
    %c0_36 = arith.constant 0 : index
    %c0_37 = arith.constant 0 : index
    %59 = vector.load %arg2[%c4, %c0_36, %c0_37] : memref<5x256x128xbf16, #tpu.memory_space<vmem>>, vector<1x256x128xbf16>
    %60 = vector.shape_cast %59 : vector<1x256x128xbf16> to vector<256x128xbf16>
    %cst_38 = arith.constant dense<0.000000e+00> : vector<8x128xf32>
    %61 = tpu.matmul %58, %60, %cst_38 {dimension_numbers = #tpu.dot_dimension_numbers<[1], [0], [0], [1], [0, 0, 1, 1], [], []>} : vector<8x256xbf16>, vector<256x128xbf16>, vector<8x128xf32> -> vector<8x128xf32>
    %c4_39 = arith.constant 4 : index
    %c0_40 = arith.constant 0 : index
    %c0_41 = arith.constant 0 : index
    %62 = vector.load %arg3[%c4_39, %c0_40, %c0_41] : memref<5x1x128xf32, #tpu.memory_space<vmem>>, vector<1x1x128xf32>
    %63 = vector.shape_cast %62 : vector<1x1x128xf32> to vector<1x128xf32>
    %64 = vector.broadcast %63 : vector<1x128xf32> to vector<8x128xf32>
    %65 = arith.addf %61, %64 : vector<8x128xf32>
    %cst_42 = arith.constant 0.000000e+00 : f32
    %66 = vector.broadcast %cst_42 : f32 to vector<8x128xf32>
    %67 = arith.maximumf %65, %66 : vector<8x128xf32>
    %c0_43 = arith.constant 0 : index
    %c0_44 = arith.constant 0 : index
    %68 = vector.load %arg4[%c0_43, %c0_44] : memref<8x128xf32, #tpu.memory_space<vmem>>, vector<8x128xf32>
    tpu.vector_store %arg4[%c0_43, %c0_44], %67 {strides = array<i32>} : memref<8x128xf32, #tpu.memory_space<vmem>>, vector<8x128xf32>,
    return
  }
}

</mosaic_0001>

<bundles_post_ra>
// kernel: graphsage_forward.1
= control target key start
LH: loop header
LB: loop body
LE: loop exit
PB: predicated region body
PF: predicated region fallthrough
CT: control target
= control target key end

     0   :  { %9 = vsyncpa [#allocation3], 0  ;;  %s1746_s0 = inlined_call_operand.hbm [shape: bf16[8,8], index: 0, kind: input, shape index: {}]   ;;  %s1747_s1 = inlined_call_operand.hbm [shape: bf16[8,128], index: 1, kind: input, shape index: {}]   ;;  %s1748_s2 = inlined_call_operand.hbm [shape: bf16[5,256,128], index: 2, kind: input, shape index: {}]   ;;  %s1749_s3 = inlined_call_operand.vmem [shape: f32[5,1,128], index: 3, kind: input, shape index: {}]   ;;  %s1750_s4 = inlined_call_operand.hbm [shape: f32[8,128], index: 4, kind: output, shape index: {}]  }
   0x1   :  { %10 = vsyncpa [#allocation6], 0 }
   0x2   :  { %11 = vsyncpa [#allocation4], 0  ;;  %s1618_s15 = smov [#allocation5]   ;;  %s1619_s17 = smov [#allocation2]  }
   0x3   :  { %s28_s16 = sshll.u32 %s1618_s15, 4  ;;  %s18_s18 = sshll.u32 %s1619_s17, 4  ;;  %s29_s16 = int_to_ptr.vmem [resolvable:$true] %s28_s16  ;;  %s19_s18 = int_to_ptr.vmem [resolvable:$true] %s18_s18 }
   0x4   :  { %s1524_s21 = scalar_lea.hbm %s1747_s1, 64 }
   0x5   :  { %p1525_p0 = scmp.ne.s32.totalorder %s1747_s1, %s1524_s21  ;;  %p1528_p1 = scmp.lt.u32.totalorder %s1524_s21, %s1747_s1 }
   0x7   :  { %p1530_p2 = pnand %p1528_p1, %p1525_p0 }
   0x9   :  { %1533 = shalt.err (!%p1530_p2)
}
   0xa   :  { %s1534_s26 = scalar_lea.vmem %s29_s16, 64  ;;  %p1539_p4 = scmp.lt.s32.totalorder %s29_s16, %s29_s16 }
   0xb   :  { %p1535_p3 = scmp.ne.s32.totalorder %s29_s16, %s1534_s26  ;;  %p1540_p5 = scmp.lt.s32.totalorder %s1534_s26, %s1534_s26 }
   0xd   :  { %p1541_p6 = por %p1540_p5, %p1539_p4 }
   0xf   :  { %p1542_p7 = pnand %p1541_p6, %p1535_p3 }
  0x11   :  { %1545 = shalt.err (!%p1542_p7)
}
  0x12   :  { %31 = dma.hbm_to_vmem [thread:$0]  %s1747_s1, 64, %s29_s16, [#allocation6]  }
  0x13   :  { %s1546_s5 = scalar_lea.hbm %s1746_s0, 64 }
  0x14   :  { %p1547_p8 = scmp.ne.s32.totalorder %s1746_s0, %s1546_s5  ;;  %p1550_p9 = scmp.lt.u32.totalorder %s1546_s5, %s1746_s0 }
  0x16   :  { %p1552_p10 = pnand %p1550_p9, %p1547_p8 }
  0x18   :  { %1555 = shalt.err (!%p1552_p10)
}
  0x19   :  { %s1556_s10 = scalar_lea.vmem %s19_s18, 64  ;;  %p1561_p12 = scmp.lt.s32.totalorder %s19_s18, %s19_s18 }
  0x1a   :  { %p1557_p11 = scmp.ne.s32.totalorder %s19_s18, %s1556_s10  ;;  %p1562_p13 = scmp.lt.s32.totalorder %s1556_s10, %s1556_s10 }
  0x1c   :  { %p1563_p0 = por %p1562_p13, %p1561_p12 }
  0x1e   :  { %p1564_p1 = pnand %p1563_p0, %p1557_p11 }
  0x20   :  { %1567 = shalt.err (!%p1564_p1)
}
  0x21   :  { %21 = dma.hbm_to_vmem [thread:$0]  %s1746_s0, 64, %s19_s18, [#allocation3]  }
  0x22   :  { %s1620_s12 = smov [#allocation7]   ;;  %s1568_s16 = scalar_lea.hbm %s1748_s2, 10240 }
  0x23   :  { %s37_s13 = sshll.u32 %s1620_s12, 4  ;;  %p1569_p2 = scmp.ne.s32.totalorder %s1748_s2, %s1568_s16  ;;  %s38_s13 = int_to_ptr.vmem [resolvable:$true] %s37_s13 }
  0x24   :  { %p1572_p3 = scmp.lt.u32.totalorder %s1568_s16, %s1748_s2 }
  0x26   :  { %p1574_p4 = pnand %p1572_p3, %p1569_p2 }
  0x28   :  { %1577 = shalt.err (!%p1574_p4)
}
  0x29   :  { %s1578_s22 = scalar_lea.vmem %s38_s13, 10240  ;;  %p1583_p6 = scmp.lt.s32.totalorder %s38_s13, %s38_s13 }
  0x2a   :  { %p1579_p5 = scmp.ne.s32.totalorder %s38_s13, %s1578_s22  ;;  %p1584_p7 = scmp.lt.s32.totalorder %s1578_s22, %s1578_s22 }
  0x2c   :  { %p1585_p8 = por %p1584_p7, %p1583_p6 }
  0x2e   :  { %p1586_p9 = pnand %p1585_p8, %p1579_p5 }
  0x30   :  { %1589 = shalt.err (!%p1586_p9)
}
  0x31   :  { %s1621_s0 = smov 64   ;;  %s1622_s18 = smov 4  }
  0x32   :  { %43 = dma.hbm_to_vmem [thread:$0]  %s1748_s2, 10240, %s38_s13, [#allocation6], %s1621_s0, %s1621_s0, %s1622_s18  }
  0x33   :  { %1612 = dma.done.wait [#allocation3], 64  }
  0x34   :  { %1613 = vsyncadd [#allocation3], 4294967232 }
  0x35   :  { %1614 = dma.done.wait [#allocation6], 10304  }
  0x36   :  { %1615 = vsyncadd [#allocation6], 4294956992  ;;  %v1623_v0 = vmov 0.0   ;;  %vm1624_vm0 = vmmov 0   ;;  %vm62_vm1 = vcmask 1043456   ;;  %v1444_v4 = vld [vmem:[#allocation7 + $0x40] sm:$0xff]  }
  0x37   :  { %1406 = vmatprep.subr.bf16.mxu0 %v1623_v0  ;;  %1408 = vmatprep.mubr.msk.bf16.mxu0 %vm1624_vm0, %v1623_v0  ;;  %v57_v1 = vld [vmem:[#allocation5] sm:$0xf]  ;;  %v1690_v2 = vld [vmem:[#allocation2] sm:$0xf]  ;;  %vm58_vm2 = vcmask 64512   ;;  %v1445_v5 = vld [vmem:[#allocation7] sm:$0xff]  }
  0x38   :  { %v64_v3 = vsel %vm62_vm1, %v57_v1, 0  ;;  %274 = vmatprep.mubr.bf16.mxu1 %v57_v1  ;;  %1288 = vmatprep.subr.bf16.mxu1 %v1444_v4  ;;  %v1446_v6 = vld [vmem:[#allocation7 + $0x48] sm:$0xff]   ;;  %v1448_v8 = vld [vmem:[#allocation7 + $0x50] sm:$0xff]   ;;  %v1450_v10 = vld [vmem:[#allocation7 + $0x58] sm:$0xff]   ;;  %s1625_s8 = smov [#allocation8]  }
  0x39   :  { %1407 = vmatpush3.bf16.msra.mxu0 %v64_v3  ;;  %1289 = vmatpush3.bf16.msra.mxu1 %v1445_v5  ;;  %v1447_v7 = vld [vmem:[#allocation7 + $0x8] sm:$0xff]   ;;  %v1449_v9 = vld [vmem:[#allocation7 + $0x10] sm:$0xff]   ;;  %v1451_v11 = vld [vmem:[#allocation7 + $0x18] sm:$0xff]   ;;  %s1182_s9 = sshll.u32 %s1625_s8, 4  ;;  %s1183_s9 = int_to_ptr.vmem [resolvable:$true] %s1182_s9 }
  0x3a   :  { %1412 = vmatprep.subr.bf16.mxu0 %v1623_v0  ;;  %1290 = vmatprep.subr.bf16.mxu1 %v1446_v6  ;;  %v1452_v12 = vld [vmem:[#allocation7 + $0x60] sm:$0xff]   ;;  %v1454_v14 = vld [vmem:[#allocation7 + $0x68] sm:$0xff]   ;;  %v1456_v16 = vld [vmem:[#allocation7 + $0x70] sm:$0xff]   ;;  %s1590_s10 = scalar_lea.vmem %s1183_s9, 128  ;;  %p1595_p11 = scmp.lt.s32.totalorder %s1183_s9, %s1183_s9 }
  0x3b   :  { %v1453_v13 = vld [vmem:[#allocation7 + $0x20] sm:$0xff]   ;;  %v1455_v15 = vld [vmem:[#allocation7 + $0x28] sm:$0xff]   ;;  %v1457_v17 = vld [vmem:[#allocation7 + $0x30] sm:$0xff]   ;;  %p1591_p10 = scmp.ne.s32.totalorder %s1183_s9, %s1590_s10  ;;  %p1596_p12 = scmp.lt.s32.totalorder %s1590_s10, %s1590_s10 }
  0x3c   :  { %1409 = vmatmul.mubr.msk.bf16.vlgmr.msra.gmra.mrb[0].mxu0 %vm58_vm2, %v1690_v2  ;;  %v1458_v18 = vld [vmem:[#allocation7 + $0x78] sm:$0xff]   ;;  %v1193_v26 = vld [vmem:[%s1749_s3] ss:$0 sm:$0xff]  ;;  %v1460_v34 = vld [vmem:[#allocation7 + $0xc0] sm:$0xff]  }
  0x3d   :  { %1414 = vmatprep.mubr.msk.bf16.mxu0 %vm1624_vm0, %v1623_v0  ;;  %1291 = vmatpush3.bf16.msra.mxu1 %v1447_v7  ;;  %v1459_v19 = vld [vmem:[#allocation7 + $0x38] sm:$0xff]   ;;  %v1461_v36 = vld [vmem:[#allocation7 + $0x80] sm:$0xff]   ;;  %v1462_v37 = vld [vmem:[#allocation7 + $0xc8] sm:$0xff]   ;;  %p1597_p13 = por %p1596_p12, %p1595_p11 }
  0x3e   :  { %1292 = vmatprep.subr.bf16.mxu1 %v1448_v8  ;;  %v1463_v38 = vld [vmem:[#allocation7 + $0x88] sm:$0xff]   ;;  %v1464_v39 = vld [vmem:[#allocation7 + $0xd0] sm:$0xff]   ;;  %v1466_v41 = vld [vmem:[#allocation7 + $0xd8] sm:$0xff]  }
  0x3f   :  { %v1465_v40 = vld [vmem:[#allocation7 + $0x90] sm:$0xff]   ;;  %v1467_v42 = vld [vmem:[#allocation7 + $0x98] sm:$0xff]   ;;  %v1468_v43 = vld [vmem:[#allocation7 + $0xe0] sm:$0xff]   ;;  %p1598_p0 = pnand %p1597_p13, %p1591_p10 }
  0x40   :  { %v1469_v44 = vld [vmem:[#allocation7 + $0xa0] sm:$0xff]   ;;  %v1470_v45 = vld [vmem:[#allocation7 + $0xe8] sm:$0xff]   ;;  %v1472_v47 = vld [vmem:[#allocation7 + $0xf0] sm:$0xff]  }
  0x41   :  { %1293 = vmatpush3.bf16.msra.mxu1 %v1449_v9  ;;  %v1471_v46 = vld [vmem:[#allocation7 + $0xa8] sm:$0xff]   ;;  %v1473_v48 = vld [vmem:[#allocation7 + $0xb0] sm:$0xff]   ;;  %v1474_v49 = vld [vmem:[#allocation7 + $0xf8] sm:$0xff]  }
  0x42   :  { %1294 = vmatprep.subr.bf16.mxu1 %v1450_v10  ;;  %v1475_v50 = vld [vmem:[#allocation7 + $0xb8] sm:$0xff]   ;;  %v1476_v56 = vld [vmem:[#allocation7 + $0x140] sm:$0xff]   ;;  %v1478_v58 = vld [vmem:[#allocation7 + $0x148] sm:$0xff]  }
  0x43   :  { %v1477_v57 = vld [vmem:[#allocation7 + $0x100] sm:$0xff]   ;;  %v1479_v59 = vld [vmem:[#allocation7 + $0x108] sm:$0xff]   ;;  %v1480_v60 = vld [vmem:[#allocation7 + $0x150] sm:$0xff]  }
  0x44   :  { %v1481_v61 = vld [vmem:[#allocation7 + $0x110] sm:$0xff]   ;;  %v1482_v62 = vld [vmem:[#allocation7 + $0x158] sm:$0xff]   ;;  %v1484_v1 = vld [vmem:[#allocation7 + $0x160] sm:$0xff]  }
  0x45   :  { %1295 = vmatpush3.bf16.msra.mxu1 %v1451_v11  ;;  %v1483_v63 = vld [vmem:[#allocation7 + $0x118] sm:$0xff]   ;;  %v1485_v3 = vld [vmem:[#allocation7 + $0x120] sm:$0xff]   ;;  %v1486_v4 = vld [vmem:[#allocation7 + $0x168] sm:$0xff]  }
  0x46   :  { %1296 = vmatprep.subr.bf16.mxu1 %v1452_v12  ;;  %v1487_v5 = vld [vmem:[#allocation7 + $0x128] sm:$0xff]   ;;  %v1488_v6 = vld [vmem:[#allocation7 + $0x170] sm:$0xff]   ;;  %v1490_v8 = vld [vmem:[#allocation7 + $0x178] sm:$0xff]  }
  0x47   :  { %v1489_v7 = vld [vmem:[#allocation7 + $0x130] sm:$0xff]  }
  0x48   :  { %v1212_v10 = vld [vmem:[%s1749_s3 + $0x1] ss:$0 sm:$0xff] }
  0x49   :  { %1297 = vmatpush3.bf16.msra.mxu1 %v1453_v13 }
  0x4a   :  { %1298 = vmatprep.subr.bf16.mxu1 %v1454_v14 }
  0x4d   :  { %1299 = vmatpush3.bf16.msra.mxu1 %v1455_v15 }
  0x4e   :  { %1300 = vmatprep.subr.bf16.mxu1 %v1456_v16 }
  0x51   :  { %1301 = vmatpush3.bf16.msra.mxu1 %v1457_v17 }
  0x52   :  { %1302 = vmatprep.subr.bf16.mxu1 %v1458_v18 }
  0x55   :  { %1303 = vmatpush3.bf16.msra.mxu1 %v1459_v19  ;;  %v1491_v19 = vld [vmem:[#allocation7 + $0x138] sm:$0xff]  }
  0x56   :  { %1336 = vmatprep.subr.bf16.mxu1 %v1476_v56  ;;  %v1508_v56 = vld [vmem:[#allocation7 + $0x240] sm:$0xff]  }
 0x10f   :  { %v100_v20 = vpop.f32.mrb[0].mxu0 }
 0x110   :  { %v106_v21 = vpack.c.bf16 %v100_v20, %v100_v20  ;;  %v1410_v22 = vpop.f32.mrb[1].mxu0 }
 0x111   :  { %v103_v23 = vpop.f32.mrb[2].mxu0 }
 0x112   :  { %v1411_v24 = vpop.f32.mrb[3].mxu0  ;;  %275 = vmatmul.mubr.bf16.vlgmr.msra.gmra.mrb[0].mxu1 %v106_v21 }
 0x113   :  { %1337 = vmatpush3.bf16.msra.mxu1 %v1477_v57  ;;  %v1509_v57 = vld [vmem:[#allocation7 + $0x200] sm:$0xff]  }
 0x114   :  { %1338 = vmatprep.subr.bf16.mxu1 %v1478_v58  ;;  %v1510_v58 = vld [vmem:[#allocation7 + $0x248] sm:$0xff]  }
 0x117   :  { %1339 = vmatpush3.bf16.msra.mxu1 %v1479_v59  ;;  %v1511_v59 = vld [vmem:[#allocation7 + $0x208] sm:$0xff]  }
 0x118   :  { %1340 = vmatprep.subr.bf16.mxu1 %v1480_v60  ;;  %v1512_v60 = vld [vmem:[#allocation7 + $0x250] sm:$0xff]  }
 0x11b   :  { %1341 = vmatpush3.bf16.msra.mxu1 %v1481_v61  ;;  %v1513_v61 = vld [vmem:[#allocation7 + $0x210] sm:$0xff]  }
 0x11c   :  { %1342 = vmatprep.subr.bf16.mxu1 %v1482_v62  ;;  %v1514_v62 = vld [vmem:[#allocation7 + $0x258] sm:$0xff]  }
 0x11f   :  { %1343 = vmatpush3.bf16.msra.mxu1 %v1483_v63  ;;  %v1515_v63 = vld [vmem:[#allocation7 + $0x218] sm:$0xff]  }
 0x120   :  { %1344 = vmatprep.subr.bf16.mxu1 %v1484_v1  ;;  %v1516_v1 = vld [vmem:[#allocation7 + $0x260] sm:$0xff]  }
 0x123   :  { %1345 = vmatpush3.bf16.msra.mxu1 %v1485_v3  ;;  %v1517_v3 = vld [vmem:[#allocation7 + $0x220] sm:$0xff]  }
 0x124   :  { %1346 = vmatprep.subr.bf16.mxu1 %v1486_v4  ;;  %v1519_v4 = vld [vmem:[#allocation7 + $0x228] sm:$0xff]  }
 0x127   :  { %1347 = vmatpush3.bf16.msra.mxu1 %v1487_v5  ;;  %v1520_v5 = vld [vmem:[#allocation7 + $0x270] sm:$0xff]  }
 0x128   :  { %1348 = vmatprep.subr.bf16.mxu1 %v1488_v6  ;;  %v1521_v6 = vld [vmem:[#allocation7 + $0x230] sm:$0xff]  }
 0x12b   :  { %1349 = vmatpush3.bf16.msra.mxu1 %v1489_v7  ;;  %v1522_v7 = vld [vmem:[#allocation7 + $0x278] sm:$0xff]  }
 0x12c   :  { %1350 = vmatprep.subr.bf16.mxu1 %v1490_v8 }
 0x12f   :  { %1351 = vmatpush3.bf16.msra.mxu1 %v1491_v19 }
 0x130   :  { %1384 = vmatprep.subr.bf16.mxu1 %v1508_v56 }
 0x1e5   :  { %v1304_v25 = vpop.f32.mrb[0].mxu1 }
 0x1e6   :  { %v1305_v27 = vpop.f32.mrb[1].mxu1 }
 0x1e7   :  { %v1306_v28 = vadd.f32 %v1305_v27, %v1304_v25  ;;  %v1307_v29 = vpop.f32.mrb[2].mxu1 }
 0x1e8   :  { %v1308_v30 = vpop.f32.mrb[3].mxu1 }
 0x1e9   :  { %v277_v31 = vadd.f32 %v1306_v28, %v1193_v26  ;;  %v1231_v26 = vld [vmem:[%s1749_s3 + $0x2] ss:$0 sm:$0xff] }
 0x1eb   :  { %v282_v32 = vmax.f32 %v277_v31, 0.0 }
 0x1ed   :  { %v283_v33 = vpack.c.bf16 %v282_v32, %v282_v32 }
 0x1ef   :  { %v285_v35 = vsel %vm62_vm1, %v283_v33, 0 }
 0x1f0   :  { %1413 = vmatpush3.bf16.msra.mxu0 %v285_v35 }
 0x1f1   :  { %1312 = vmatprep.subr.bf16.mxu0 %v1460_v34  ;;  %v1492_v34 = vld [vmem:[#allocation7 + $0x1c0] sm:$0xff]  }
 0x1f3   :  { %1415 = vmatmul.mubr.msk.bf16.vlgmr.msra.gmra.mrb[4].mxu0 %vm58_vm2, %v1690_v2 }
 0x1f4   :  { %497 = vmatprep.mubr.bf16.mxu0 %v283_v33  ;;  %1313 = vmatpush3.bf16.msra.mxu0 %v1461_v36  ;;  %v1493_v36 = vld [vmem:[#allocation7 + $0x180] sm:$0xff]  }
 0x1f5   :  { %1314 = vmatprep.subr.bf16.mxu0 %v1462_v37  ;;  %v1494_v37 = vld [vmem:[#allocation7 + $0x1c8] sm:$0xff]  }
 0x1f8   :  { %1315 = vmatpush3.bf16.msra.mxu0 %v1463_v38  ;;  %v1495_v38 = vld [vmem:[#allocation7 + $0x188] sm:$0xff]  }
 0x1f9   :  { %1316 = vmatprep.subr.bf16.mxu0 %v1464_v39  ;;  %v1496_v39 = vld [vmem:[#allocation7 + $0x1d0] sm:$0xff]  }
 0x1fc   :  { %1317 = vmatpush3.bf16.msra.mxu0 %v1465_v40  ;;  %v1497_v40 = vld [vmem:[#allocation7 + $0x190] sm:$0xff]  }
 0x1fd   :  { %1318 = vmatprep.subr.bf16.mxu0 %v1466_v41  ;;  %v1498_v41 = vld [vmem:[#allocation7 + $0x1d8] sm:$0xff]  }
 0x200   :  { %1319 = vmatpush3.bf16.msra.mxu0 %v1467_v42  ;;  %v1499_v42 = vld [vmem:[#allocation7 + $0x198] sm:$0xff]  }
 0x201   :  { %1320 = vmatprep.subr.bf16.mxu0 %v1468_v43  ;;  %v1500_v43 = vld [vmem:[#allocation7 + $0x1e0] sm:$0xff]  }
 0x204   :  { %1321 = vmatpush3.bf16.msra.mxu0 %v1469_v44  ;;  %v1501_v44 = vld [vmem:[#allocation7 + $0x1a0] sm:$0xff]  }
 0x205   :  { %1322 = vmatprep.subr.bf16.mxu0 %v1470_v45  ;;  %v1502_v45 = vld [vmem:[#allocation7 + $0x1e8] sm:$0xff]  }
 0x208   :  { %1323 = vmatpush3.bf16.msra.mxu0 %v1471_v46  ;;  %v1503_v46 = vld [vmem:[#allocation7 + $0x1a8] sm:$0xff]  }
 0x209   :  { %1324 = vmatprep.subr.bf16.mxu0 %v1472_v47  ;;  %v1504_v47 = vld [vmem:[#allocation7 + $0x1f0] sm:$0xff]  }
 0x20c   :  { %1325 = vmatpush3.bf16.msra.mxu0 %v1473_v48  ;;  %v1505_v48 = vld [vmem:[#allocation7 + $0x1b0] sm:$0xff]  }
 0x20d   :  { %1326 = vmatprep.subr.bf16.mxu0 %v1474_v49  ;;  %v1506_v49 = vld [vmem:[#allocation7 + $0x1f8] sm:$0xff]  }
 0x210   :  { %1327 = vmatpush3.bf16.msra.mxu0 %v1475_v50  ;;  %v1507_v50 = vld [vmem:[#allocation7 + $0x1b8] sm:$0xff]  }
 0x211   :  { %1418 = vmatprep.subr.bf16.mxu0 %v1623_v0 }
 0x2c6   :  { %v321_v51 = vpop.f32.mrb[4].mxu0 }
 0x2c7   :  { %v327_v52 = vpack.c.bf16 %v321_v51, %v321_v51  ;;  %v1416_v53 = vpop.f32.mrb[5].mxu0 }
 0x2c8   :  { %v324_v54 = vpop.f32.mrb[6].mxu0 }
 0x2c9   :  { %v1417_v55 = vpop.f32.mrb[7].mxu0  ;;  %498 = vmatmul.mubr.bf16.vlgmr.msra.gmra.mrb[8].mxu0 %v327_v52 }
 0x2ca   :  { %1420 = vmatprep.mubr.msk.bf16.mxu0 %vm1624_vm0, %v1623_v0 }
 0x39c   :  { %v1328_v9 = vpop.f32.mrb[8].mxu0 }
 0x39d   :  { %v1329_v11 = vpop.f32.mrb[9].mxu0 }
 0x39e   :  { %v1330_v12 = vadd.f32 %v1329_v11, %v1328_v9  ;;  %v1331_v13 = vpop.f32.mrb[10].mxu0  ;;  %v1250_v9 = vld [vmem:[%s1749_s3 + $0x3] ss:$0 sm:$0xff] }
 0x39f   :  { %v1332_v14 = vpop.f32.mrb[11].mxu0 }
 0x3a0   :  { %v500_v15 = vadd.f32 %v1330_v12, %v1212_v10 }
 0x3a2   :  { %v505_v16 = vmax.f32 %v500_v15, 0.0 }
 0x3a4   :  { %v506_v17 = vpack.c.bf16 %v505_v16, %v505_v16 }
 0x3a6   :  { %720 = vmatprep.mubr.bf16.mxu1 %v506_v17  ;;  %v508_v18 = vsel %vm62_vm1, %v506_v17, 0 }
 0x3a7   :  { %1419 = vmatpush3.bf16.msra.mxu0 %v508_v18  ;;  %v1523_v18 = vld [vmem:[#allocation7 + $0x238] sm:$0xff]  }
 0x3a8   :  { %1424 = vmatprep.subr.bf16.mxu0 %v1623_v0 }
 0x3aa   :  { %1421 = vmatmul.mubr.msk.bf16.vlgmr.msra.gmra.mrb[12].mxu0 %vm58_vm2, %v1690_v2 }
 0x3ab   :  { %1426 = vmatprep.mubr.msk.bf16.mxu0 %vm1624_vm0, %v1623_v0 }
 0x47d   :  { %v544_v20 = vpop.f32.mrb[12].mxu0 }
 0x47e   :  { %v550_v21 = vpack.c.bf16 %v544_v20, %v544_v20  ;;  %v1422_v22 = vpop.f32.mrb[13].mxu0 }
 0x47f   :  { %v547_v23 = vpop.f32.mrb[14].mxu0 }
 0x480   :  { %v1423_v24 = vpop.f32.mrb[15].mxu0  ;;  %721 = vmatmul.mubr.bf16.vlgmr.msra.gmra.mrb[4].mxu1 %v550_v21 }
 0x481   :  { %1385 = vmatpush3.bf16.msra.mxu1 %v1509_v57 }
 0x482   :  { %1386 = vmatprep.subr.bf16.mxu1 %v1510_v58 }
 0x485   :  { %1387 = vmatpush3.bf16.msra.mxu1 %v1511_v59 }
 0x486   :  { %1388 = vmatprep.subr.bf16.mxu1 %v1512_v60 }
 0x489   :  { %1389 = vmatpush3.bf16.msra.mxu1 %v1513_v61 }
 0x48a   :  { %1390 = vmatprep.subr.bf16.mxu1 %v1514_v62 }
 0x48d   :  { %1391 = vmatpush3.bf16.msra.mxu1 %v1515_v63 }
 0x48e   :  { %1392 = vmatprep.subr.bf16.mxu1 %v1516_v1 }
 0x491   :  { %1393 = vmatpush3.bf16.msra.mxu1 %v1517_v3 }
 0x553   :  { %v1352_v25 = vpop.f32.mrb[4].mxu1 }
 0x554   :  { %v1353_v27 = vpop.f32.mrb[5].mxu1 }
 0x555   :  { %v1354_v28 = vadd.f32 %v1353_v27, %v1352_v25  ;;  %v1355_v29 = vpop.f32.mrb[6].mxu1  ;;  %v1269_v25 = vld [vmem:[%s1749_s3 + $0x4] ss:$0 sm:$0xff] }
 0x556   :  { %v1356_v30 = vpop.f32.mrb[7].mxu1 }
 0x557   :  { %v723_v31 = vadd.f32 %v1354_v28, %v1231_v26 }
 0x559   :  { %v728_v32 = vmax.f32 %v723_v31, 0.0 }
 0x55b   :  { %v729_v33 = vpack.c.bf16 %v728_v32, %v728_v32 }
 0x55d   :  { %v731_v35 = vsel %vm62_vm1, %v729_v33, 0 }
 0x55e   :  { %1425 = vmatpush3.bf16.msra.mxu0 %v731_v35 }
 0x55f   :  { %1360 = vmatprep.subr.bf16.mxu0 %v1492_v34 }
 0x561   :  { %1427 = vmatmul.mubr.msk.bf16.vlgmr.msra.gmra.mrb[16].mxu0 %vm58_vm2, %v1690_v2 }
 0x562   :  { %943 = vmatprep.mubr.bf16.mxu0 %v729_v33  ;;  %1361 = vmatpush3.bf16.msra.mxu0 %v1493_v36 }
 0x563   :  { %1362 = vmatprep.subr.bf16.mxu0 %v1494_v37 }
 0x566   :  { %1363 = vmatpush3.bf16.msra.mxu0 %v1495_v38 }
 0x567   :  { %1364 = vmatprep.subr.bf16.mxu0 %v1496_v39 }
 0x56a   :  { %1365 = vmatpush3.bf16.msra.mxu0 %v1497_v40 }
 0x56b   :  { %1366 = vmatprep.subr.bf16.mxu0 %v1498_v41 }
 0x56e   :  { %1367 = vmatpush3.bf16.msra.mxu0 %v1499_v42 }
 0x56f   :  { %1368 = vmatprep.subr.bf16.mxu0 %v1500_v43 }
 0x572   :  { %1369 = vmatpush3.bf16.msra.mxu0 %v1501_v44 }
 0x573   :  { %1370 = vmatprep.subr.bf16.mxu0 %v1502_v45 }
 0x576   :  { %1371 = vmatpush3.bf16.msra.mxu0 %v1503_v46 }
 0x577   :  { %1372 = vmatprep.subr.bf16.mxu0 %v1504_v47 }
 0x57a   :  { %1373 = vmatpush3.bf16.msra.mxu0 %v1505_v48 }
 0x57b   :  { %1374 = vmatprep.subr.bf16.mxu0 %v1506_v49 }
 0x57e   :  { %1375 = vmatpush3.bf16.msra.mxu0 %v1507_v50 }
 0x57f   :  { %1430 = vmatprep.subr.bf16.mxu0 %v1623_v0 }
 0x634   :  { %v767_v51 = vpop.f32.mrb[16].mxu0 }
 0x635   :  { %v773_v52 = vpack.c.bf16 %v767_v51, %v767_v51  ;;  %v1428_v53 = vpop.f32.mrb[17].mxu0 }
 0x636   :  { %v770_v54 = vpop.f32.mrb[18].mxu0 }
 0x637   :  { %v1429_v55 = vpop.f32.mrb[19].mxu0  ;;  %944 = vmatmul.mubr.bf16.vlgmr.msra.gmra.mrb[20].mxu0 %v773_v52 }
 0x638   :  { %1432 = vmatprep.mubr.msk.bf16.mxu0 %vm1624_vm0, %v1623_v0  ;;  %v1518_v0 = vld [vmem:[#allocation7 + $0x268] sm:$0xff]  }
 0x639   :  { %1394 = vmatprep.subr.bf16.mxu1 %v1518_v0 }
 0x63a   :  { %1395 = vmatpush3.bf16.msra.mxu1 %v1519_v4 }
 0x63b   :  { %1396 = vmatprep.subr.bf16.mxu1 %v1520_v5 }
 0x63e   :  { %1397 = vmatpush3.bf16.msra.mxu1 %v1521_v6 }
 0x63f   :  { %1398 = vmatprep.subr.bf16.mxu1 %v1522_v7 }
 0x642   :  { %1399 = vmatpush3.bf16.msra.mxu1 %v1523_v18 }
 0x70a   :  { %v1376_v8 = vpop.f32.mrb[20].mxu0 }
 0x70b   :  { %v1377_v10 = vpop.f32.mrb[21].mxu0 }
 0x70c   :  { %v1378_v11 = vadd.f32 %v1377_v10, %v1376_v8  ;;  %v1379_v12 = vpop.f32.mrb[22].mxu0 }
 0x70d   :  { %v1380_v13 = vpop.f32.mrb[23].mxu0 }
 0x70e   :  { %v946_v14 = vadd.f32 %v1378_v11, %v1250_v9 }
 0x710   :  { %v951_v15 = vmax.f32 %v946_v14, 0.0 }
 0x712   :  { %v952_v16 = vpack.c.bf16 %v951_v15, %v951_v15 }
 0x714   :  { %1166 = vmatprep.mubr.bf16.mxu1 %v952_v16  ;;  %v954_v17 = vsel %vm62_vm1, %v952_v16, 0 }
 0x715   :  { %1431 = vmatpush3.bf16.msra.mxu0 %v954_v17 }
 0x718   :  { %1433 = vmatmul.mubr.msk.bf16.vlgmr.msra.gmra.mrb[24].mxu0 %vm58_vm2, %v1690_v2 }
 0x7eb   :  { %v990_v19 = vpop.f32.mrb[24].mxu0 }
 0x7ec   :  { %v996_v20 = vpack.c.bf16 %v990_v19, %v990_v19  ;;  %v1434_v21 = vpop.f32.mrb[25].mxu0 }
 0x7ed   :  { %v993_v22 = vpop.f32.mrb[26].mxu0 }
 0x7ee   :  { %v1435_v23 = vpop.f32.mrb[27].mxu0  ;;  %1167 = vmatmul.mubr.bf16.vlgmr.msra.gmra.mrb[8].mxu1 %v996_v20 }
 0x8c1   :  { %v1400_v24 = vpop.f32.mrb[8].mxu1 }
 0x8c2   :  { %v1401_v26 = vpop.f32.mrb[9].mxu1 }
 0x8c3   :  { %v1402_v27 = vadd.f32 %v1401_v26, %v1400_v24  ;;  %v1403_v28 = vpop.f32.mrb[10].mxu1 }
 0x8c4   :  { %v1404_v29 = vpop.f32.mrb[11].mxu1 }
 0x8c5   :  { %v1169_v2 = vadd.f32 %v1402_v27, %v1269_v25 }
 0x8c7   :  { %v1174_v30 = vmax.f32 %v1169_v2, 0.0 }
 0x8c9   :  { %1175 = vst [vmem:[#allocation8] sm:$0xff] %v1174_v30 }
 0x8ca   :  { %1601 = shalt.err (!%p1598_p0)
}
 0x8cb   :  { %s1602_s3 = scalar_lea.hbm %s1750_s4, 128 }
 0x8cc   :  { %p1603_p1 = scmp.ne.s32.totalorder %s1750_s4, %s1602_s3  ;;  %p1606_p2 = scmp.lt.u32.totalorder %s1602_s3, %s1750_s4 }
 0x8ce   :  { %p1608_p3 = pnand %p1606_p2, %p1603_p1 }
 0x8d0   :  { %1611 = shalt.err (!%p1608_p3)
}
 0x8d1   :  { %1185 = dma.vmem_to_hbm [thread:$0]  %s1183_s9, 128, %s1750_s4, [#allocation4]  }
 0x8d2   :  { %1616 = dma.done.wait [#allocation4], 128  }
 0x8d3   :  { %1617 = vsyncadd [#allocation4], 4294967168 }
 0x8d4   :  { %1189 = vsyncpa [#allocation3], 1 }
 0x8d5   :  { %1190 = vsyncpa [#allocation6], 1 }
 0x8d6   :  { %1191 = vsyncpa [#allocation4], 1 }

</bundles_post_ra>
